<compile_context>
chip_gen: v5e
topology: v5e:2x2
jax: 0.10.0
libtpu: 0.0.40
codegen_flags: <defaults>
</compile_context>

<pallas_src>
import jax
import jax.numpy as jnp
import numpy as np
from jax import lax
from jax.experimental import pallas as pl
from jax.experimental.pallas import tpu as pltpu


def _round_up(n: int, m: int) -> int:
    return ((n + m - 1) // m) * m


def _sinusoidal_kernel(x_ref, f_ref, o_ref):
    # x_ref: (TB, 1)  f32 timesteps (column vector)
    # f_ref: (1, dim) f32 frequency table, tiled twice: [f_0..f_{h-1}, f_0..f_{h-1}]
    # o_ref: (TB, dim) f32 output
    dim = o_ref.shape[1]
    half = dim // 2
    arg = x_ref[...] * f_ref[...]                       # (TB, 1)*(1, dim) -> (TB, dim)
    col = lax.broadcasted_iota(jnp.int32, arg.shape, 1)
    # One full-width (lane-dense) store: sin in the first half of the lanes,
    # cos in the second half — identical values to cat(sin(arg), cos(arg)).
    o_ref[...] = jnp.where(col < half, jnp.sin(arg), jnp.cos(arg))


def sinusoidal_pos_emb(x: jax.Array, dim: int, *, block_rows: int = 2048) -> jax.Array:
    """x: (B,) float timesteps -> (B, dim) f32 embedding. dim must be even, >= 4."""
    assert dim % 2 == 0 and dim >= 4, "dim must be even and >= 4"
    half = dim // 2
    B = x.shape[0]

    # Static frequency table, computed once at trace time on the host, tiled
    # twice so the kernel can emit a single full-width row.
    freqs_np = np.exp(
        -np.log(10000.0) * np.arange(half, dtype=np.float64) / (half - 1)
    ).astype(np.float32)
    freqs_full = jnp.asarray(np.concatenate([freqs_np, freqs_np])).reshape(1, dim)

    # Row tile:
    #  * >= 2 grid steps when B allows (v7x megacore sharding),
    #  * capped at block_rows (amortize per-step overhead on v5e/v6e),
    #  * capped so the output block is <= 8 MiB (16 MiB double-buffered),
    #    well under v7x's 32 MiB default scoped-VMEM budget.
    vmem_cap_rows = max(8, (((8 << 20) // (dim * 4)) // 8) * 8)
    TB = max(8, min(block_rows, _round_up(pl.cdiv(B, 2), 8), vmem_cap_rows))
    grid = pl.cdiv(B, TB)  # no padding: TPU Pallas clips the ragged last block

    x2d = x.astype(jnp.float32).reshape(B, 1)

    return pl.pallas_call(
        _sinusoidal_kernel,
        out_shape=jax.ShapeDtypeStruct((B, dim), jnp.float32),
        grid_spec=pltpu.PrefetchScalarGridSpec(
            num_scalar_prefetch=0,
            grid=(grid,),
            in_specs=[
                pl.BlockSpec((TB, 1), lambda i: (i, 0)),    # timesteps (column)
                pl.BlockSpec((1, dim), lambda i: (0, 0)),   # constant freq table
            ],
            out_specs=pl.BlockSpec((TB, dim), lambda i: (i, 0)),
        ),
        compiler_params=pltpu.CompilerParams(
            dimension_semantics=("parallel",),
        ),
        cost_estimate=pl.CostEstimate(
            flops=2 * B * dim,
            transcendentals=2 * B * dim,
            bytes_accessed=4 * (B + dim + B * dim),
        ),
    )(x2d, freqs_full)


def _reference(x: np.ndarray, dim: int) -> np.ndarray:
    # Faithful f32 pipeline (matches the PyTorch module's float32 math).
    half = dim // 2
    freqs = np.exp(
        -np.log(10000.0) * np.arange(half, dtype=np.float64) / (half - 1)
    ).astype(np.float32)
    arg = (x.astype(np.float32)[:, None] * freqs[None, :]).astype(np.float32)
    return np.concatenate([np.sin(arg), np.cos(arg)], axis=-1).astype(np.float32)


if __name__ == "__main__":
    key = jax.random.PRNGKey(0)
    B, DIM = 8, 32
    # Diffusion-style timesteps (small positive floats up to ~1000).
    x = jax.random.uniform(key, (B,), dtype=jnp.float32, minval=0.0, maxval=1000.0)

    out = jax.block_until_ready(sinusoidal_pos_emb(x, DIM))

    ref = _reference(np.asarray(x), DIM)
    assert out.shape == (B, DIM), out.shape
    # f32 sin/cos at args up to ~1e3: allow a few ULP of slack vs the host libm.
    np.testing.assert_allclose(np.asarray(out), ref, rtol=1e-4, atol=1e-4)
    print("KERNEL_OK")
</pallas_src>

<mosaic_0001>
module attributes {stable_mosaic.version = 11 : i64} {
  func.func @_sinusoidal_kernel(%arg0: i32, %arg1: memref<8x1xf32, #tpu.memory_space<vmem>>, %arg2: memref<1x32xf32, #tpu.memory_space<vmem>>, %arg3: memref<8x32xf32, #tpu.memory_space<vmem>>) attributes {dimension_semantics = [#tpu.dimension_semantics<parallel>], iteration_bounds = array<i64: 1>, scalar_prefetch = 0 : i64, scratch_operands = 0 : i64, tpu.core_type = #tpu.core_type<tc>, window_params = [{transform_indices = @transform_0, window_bounds = array<i64: 8, 1>}, {pipeline_mode = #tpu.pipeline_mode<synchronous>, transform_indices = @transform_1, window_bounds = array<i64: 1, 32>}, {transform_indices = @transform_2, window_bounds = array<i64: 8, 32>}]} {
    %c0 = arith.constant 0 : index
    %c0_0 = arith.constant 0 : index
    %0 = vector.load %arg1[%c0, %c0_0] : memref<8x1xf32, #tpu.memory_space<vmem>>, vector<8x1xf32>
    %c0_1 = arith.constant 0 : index
    %c0_2 = arith.constant 0 : index
    %1 = vector.load %arg2[%c0_1, %c0_2] : memref<1x32xf32, #tpu.memory_space<vmem>>, vector<1x32xf32>
    %2 = vector.broadcast %0 : vector<8x1xf32> to vector<8x32xf32>
    %3 = vector.broadcast %1 : vector<1x32xf32> to vector<8x32xf32>
    %4 = arith.mulf %2, %3 : vector<8x32xf32>
    %5 = tpu.iota {dimensions = array<i32: 1>} : vector<8x32xi32>
    %c16_i32 = arith.constant 16 : i32
    %6 = vector.broadcast %c16_i32 : i32 to vector<8x32xi32>
    %7 = arith.cmpi slt, %5, %6 : vector<8x32xi32>
    %8 = math.sin %4 : vector<8x32xf32>
    %9 = math.cos %4 : vector<8x32xf32>
    %10 = arith.select %7, %8, %9 : vector<8x32xi1>, vector<8x32xf32>
    %c0_3 = arith.constant 0 : index
    %c0_4 = arith.constant 0 : index
    %11 = vector.load %arg3[%c0_3, %c0_4] : memref<8x32xf32, #tpu.memory_space<vmem>>, vector<8x32xf32>
    tpu.vector_store %arg3[%c0_3, %c0_4], %10 {strides = array<i32>} : memref<8x32xf32, #tpu.memory_space<vmem>>, vector<8x32xf32>,
    return
  }
  func.func @transform_0(%arg0: i32) -> (i32, i32) {
    %c0_i32 = arith.constant 0 : i32
    %c0_i32_0 = arith.constant 0 : i32
    return %arg0, %c0_i32 : i32, i32
  }
  func.func @transform_1(%arg0: i32) -> (i32, i32) {
    %c0_i32 = arith.constant 0 : i32
    %c0_i32_0 = arith.constant 0 : i32
    %c0_i32_1 = arith.constant 0 : i32
    return %c0_i32, %c0_i32_0 : i32, i32
  }
  func.func @transform_2(%arg0: i32) -> (i32, i32) {
    %c0_i32 = arith.constant 0 : i32
    %c0_i32_0 = arith.constant 0 : i32
    return %arg0, %c0_i32 : i32, i32
  }
}

</mosaic_0001>

<bundles_post_ra>
// kernel: tpu_custom_call.1
= control target key start
LH: loop header
LB: loop body
LE: loop exit
PB: predicated region body
PF: predicated region fallthrough
CT: control target
= control target key end

     0   :  { %v396_v1 = vmov 0   ;;  %s491_s0 = inlined_call_operand.vmem [shape: f32[8,1], index: 0, kind: input, shape index: {}]   ;;  %s492_s1 = inlined_call_operand.vmem [shape: f32[1,32], index: 1, kind: input, shape index: {}]   ;;  %s493_s2 = inlined_call_operand.hbm [shape: f32[8,32], index: 2, kind: output, shape index: {}]  }
   0x1   :  { %v12_v0 = vld [vmem:[%s491_s0] sm:$0xff]  ;;  %368 = vset.pattern.permute.xlu0 %v396_v1 }
   0x2   :  { %16 = vperm.xlu0 %368, %v12_v0  }
   0x3   :  { %7 = vsyncpa [#allocation3], 0  ;;  %v369_v2 = vld [vmem:[%s492_s1] ss:$0 sm:$0xff]  ;;  %v397_v16 = vmov 683565275  }
   0x4   :  { %v398_v18 = vmov 2475754826   ;;  %v399_v21 = vmov 2131351028   ;;  %v400_v24 = vmov 2102212464  }
   0x5   :  { %v401_v27 = vmov 920167782   ;;  %v402_v30 = vmov 1326507024   ;;  %s403_s0 = smov [#allocation2]   ;;  %s345_s15 = sshll.u32 %s493_s2, 4  ;;  %s346_s15 = int_to_ptr.hbm [resolvable:$true] %s345_s15 }
   0x6   :  { %s343_s1 = sshll.u32 %s403_s0, 4  ;;  %s344_s1 = int_to_ptr.vmem [resolvable:$true] %s343_s1 }
  0x74   :  { %v17_v3 = vpop.permute.xlu0 %16 }
  0x75   :  { %v426_v4 = vmul.f32 %v369_v2, %v17_v3 }
  0x77   :  { %v29_v5 = vand.u32 2139095040, %v426_v4  ;;  %v26_v8 = vand.u32 2147483647, %v426_v4  ;;  %vm28_vm12 = vcmp.lt.s32.totalorder %v426_v4, 0 }
  0x79   :  { %v30_v6 = vshrl.u32 %v29_v5, 23  ;;  %v33_v10 = vand.u32 8388607, %v26_v8  ;;  %vm27_vm13 = vcmp.le.f32.partialorder %v26_v8, 0.7853982 }
  0x7b   :  { %v354_v7 = vadd.s32 4294967169, %v30_v6  ;;  %v34_v14 = vor.u32 8388608, %v33_v10 }
  0x7d   :  { %v36_v9 = vadd.s32 1, %v354_v7  ;;  %v443_v37 = vshll.u32 %v34_v14, 8 }
  0x7f   :  { %vm37_vm0 = vcmp.gt.s32.totalorder %v36_v9, 0  ;;  %v75_v46 = vand.u32 65535, %v443_v37  ;;  %v76_v47 = vshrl.u32 %v443_v37, 16 }
  0x80   :  { %v38_v11 = vsel %vm37_vm0, %v36_v9, 0 }
  0x81   :  { %v40_v12 = vand.u32 31, %v38_v11  ;;  %v434_v15 = vshrl.u32 %v38_v11, 5 }
  0x83   :  { %v432_v13 = vsub.s32 32, %v40_v12  ;;  %v43_v17 = vshll.u32 %v397_v16, %v40_v12  ;;  %v46_v19 = vshll.u32 %v398_v18, %v40_v12  ;;  %v49_v23 = vshll.u32 %v399_v21, %v40_v12 }
  0x84   :  { %v52_v26 = vshll.u32 %v400_v24, %v40_v12  ;;  %v55_v29 = vshll.u32 %v401_v27, %v40_v12  ;;  %vm58_vm1 = vcmp.lt.s32.totalorder %v434_v15, 1  ;;  %vm61_vm2 = vcmp.lt.s32.totalorder %v434_v15, 4 }
  0x85   :  { %v44_v20 = vshrl.u32 %v398_v18, %v432_v13  ;;  %v47_v22 = vshrl.u32 %v399_v21, %v432_v13  ;;  %v50_v25 = vshrl.u32 %v400_v24, %v432_v13  ;;  %v53_v28 = vshrl.u32 %v401_v27, %v432_v13 }
  0x86   :  { %v56_v31 = vshrl.u32 %v402_v30, %v432_v13  ;;  %vm60_vm3 = vcmp.lt.s32.totalorder %v434_v15, 3  ;;  %vm59_vm4 = vcmp.lt.s32.totalorder %v434_v15, 2  ;;  %v42_v11 = vshrl.u32 %v397_v16, %v432_v13 }
  0x87   :  { %v45_v32 = vor.u32 %v44_v20, %v43_v17  ;;  %v48_v33 = vor.u32 %v47_v22, %v46_v19  ;;  %v51_v34 = vor.u32 %v50_v25, %v49_v23  ;;  %v54_v35 = vor.u32 %v53_v28, %v52_v26 }
  0x88   :  { %v57_v36 = vor.u32 %v56_v31, %v55_v29 }
  0x89   :  { %v66_v38 = vsel %vm58_vm1, %v45_v32, %v48_v33  ;;  %v70_v39 = vsel %vm58_vm1, %v48_v33, %v51_v34  ;;  %v67_v40 = vsel %vm61_vm2, %v54_v35, 920167782  ;;  %v63_v7 = vsel %vm61_vm2, %v51_v34, 2102212464 }
  0x8a   :  { %v71_v41 = vsel %vm61_vm2, %v57_v36, 1326507024  ;;  %v68_v42 = vsel %vm60_vm3, %v51_v34, %v67_v40  ;;  %v62_v20 = vsel %vm58_vm1, %v42_v11, %v45_v32  ;;  %v64_v21 = vsel %vm60_vm3, %v48_v33, %v63_v7 }
  0x8b   :  { %v72_v43 = vsel %vm60_vm3, %v54_v35, %v71_v41  ;;  %v69_v44 = vsel %vm59_vm4, %v66_v38, %v68_v42  ;;  %v65_v13 = vsel %vm59_vm4, %v62_v20, %v64_v21 }
  0x8c   :  { %v73_v45 = vsel %vm59_vm4, %v70_v39, %v72_v43  ;;  %v99_v50 = vand.u32 65535, %v69_v44  ;;  %v100_v51 = vshrl.u32 %v69_v44, 16  ;;  %v119_v28 = vmul.u32 %v443_v37, %v65_v13 }
  0x8d   :  { %v77_v48 = vand.u32 65535, %v73_v45  ;;  %v78_v49 = vshrl.u32 %v73_v45, 16 }
  0x8e   :  { %v102_v54 = vmul.u32 %v100_v51, %v75_v46  ;;  %v103_v55 = vmul.u32 %v99_v50, %v76_v47  ;;  %v101_v59 = vmul.u32 %v99_v50, %v75_v46  ;;  %v104_v63 = vmul.u32 %v100_v51, %v76_v47 }
  0x8f   :  { %v80_v52 = vmul.u32 %v78_v49, %v75_v46  ;;  %v81_v53 = vmul.u32 %v77_v48, %v76_v47  ;;  %v79_v56 = vmul.u32 %v77_v48, %v75_v46  ;;  %v82_v58 = vmul.u32 %v78_v49, %v76_v47 }
  0x90   :  { %v105_v60 = vshll.u32 %v102_v54, 16  ;;  %v107_v2 = vshll.u32 %v103_v55, 16  ;;  %v106_v18 = vshrl.u32 %v102_v54, 16  ;;  %v108_v24 = vshrl.u32 %v103_v55, 16 }
  0x91   :  { %v83_v57 = vshll.u32 %v80_v52, 16  ;;  %v85_v61 = vshll.u32 %v81_v53, 16  ;;  %v84_v12 = vshrl.u32 %v80_v52, 16  ;;  %v86_v22 = vshrl.u32 %v81_v53, 16 }
  0x92   :  { %vm109_vm6 = vc.u32 %v101_v59, %v105_v60  ;;  %v111_v3 = vadd.s32 %v105_v60, %v101_v59 }
  0x93   :  { %vm87_vm5 = vc.u32 %v79_v56, %v83_v57  ;;  %v89_v62 = vadd.s32 %v83_v57, %v79_v56  ;;  %v110_v6 = vsel %vm109_vm6, 1, %v396_v1  ;;  %vm336_vm6 = vcmask 261120  }
  0x94   :  { %v88_v0 = vsel %vm87_vm5, 1, %v396_v1  ;;  %v112_v10 = vadd.s32 %v110_v6, %v104_v63  ;;  %vm113_vm8 = vc.u32 %v111_v3, %v107_v2  ;;  %v115_v27 = vadd.s32 %v111_v3, %v107_v2 }
  0x95   :  { %v90_v5 = vadd.s32 %v88_v0, %v82_v58  ;;  %vm91_vm7 = vc.u32 %v89_v62, %v85_v61  ;;  %v114_v17 = vsel %vm113_vm8, 1, %v396_v1  ;;  %v23_v3 = vlaneseq }
  0x96   :  { %v92_v9 = vsel %vm91_vm7, 1, %v396_v1  ;;  %v116_v19 = vadd.s32 %v114_v17, %v112_v10  ;;  %vm169_vm5 = vweird.f32 %v426_v4 }
  0x97   :  { %v94_v14 = vadd.s32 %v92_v9, %v90_v5  ;;  %v24_v11 = vand.u32 127, %v23_v3 }
  0x98   :  { %v117_v25 = vadd.s32 %v116_v19, %v106_v18 }
  0x99   :  { %v95_v23 = vadd.s32 %v94_v14, %v84_v12  ;;  %vm25_vm1 = vcmp.lt.s32.totalorder %v24_v11, 16 }
  0x9a   :  { %v118_v16 = vadd.s32 %v117_v25, %v108_v24 }
  0x9b   :  { %v96_v26 = vadd.s32 %v95_v23, %v86_v22 }
  0x9c   :  { %v122_v1 = vadd.s32 1, %v118_v16 }
  0x9d   :  { %vm121_vm9 = vc.u32 %v96_v26, %v115_v27  ;;  %v120_v15 = vadd.s32 %v115_v27, %v96_v26 }
  0x9e   :  { %v123_v29 = vsel %vm121_vm9, %v122_v1, %v118_v16 }
  0x9f   :  { %v124_v30 = vadd.s32 %v123_v29, %v119_v28 }
  0xa1   :  { %v125_v31 = vadd.s32 536870912, %v124_v30 }
  0xa3   :  { %v126_v32 = vshrl.u32 %v125_v31, 30 }
  0xa5   :  { %v127_v34 = vshll.u32 %v126_v32, 30  ;;  %v150_v53 = vsub.s32 4, %v126_v32 }
  0xa7   :  { %v128_v33 = vsub.s32 %v124_v30, %v127_v34  ;;  %v151_v58 = vsel %vm28_vm12, %v150_v53, %v126_v32 }
  0xa8   :  { %v153_v62 = vsel %vm27_vm13, 0, %v151_v58 }
  0xa9   :  { %vm129_vm10 = vcmp.lt.s32.totalorder %v128_v33, 0  ;;  %v130_v35 = vsub.s32 0, %v128_v33  ;;  %v170_v5 = vadd.s32 3, %v153_v62  ;;  %v325_v10 = vand.u32 3, %v153_v62 }
  0xab   :  { %v131_v36 = vsel %vm129_vm10, %v130_v35, %v128_v33  ;;  %v171_v12 = vand.u32 3, %v170_v5  ;;  %vm326_vm14 = vcmp.lt.s32.totalorder %v325_v10, 2  ;;  %vm327_vm15 = vcmp.eq.s32.totalorder %v325_v10, 0 }
  0xac   :  { %v132_v38 = vclz %v131_v36  ;;  %vm330_vm0 = vcmp.eq.s32.totalorder %v325_v10, 2 }
  0xad   :  { %vm172_vm2 = vcmp.lt.s32.totalorder %v171_v12, 2  ;;  %vm173_vm3 = vcmp.eq.s32.totalorder %v171_v12, 0  ;;  %vm176_vm4 = vcmp.eq.s32.totalorder %v171_v12, 2 }
  0xae   :  { %v355_v39 = vadd.s32 4294967294, %v132_v38 }
  0xb0   :  { %vm356_vm11 = vcmp.lt.s32.totalorder %v355_v39, 0 }
  0xb1   :  { %v135_v40 = vsel %vm356_vm11, 0, %v355_v39 }
  0xb2   :  { %v136_v41 = vsub.s32 32, %v135_v40  ;;  %v140_v42 = vsub.s32 4294967266, %v135_v40  ;;  %v137_v43 = vshll.u32 %v128_v33, %v135_v40 }
  0xb4   :  { %v138_v44 = vshrl.u32 %v120_v15, %v136_v41  ;;  %v141_v45 = vadd.s32 127, %v140_v42 }
  0xb6   :  { %v139_v37 = vor.u32 %v138_v44, %v137_v43  ;;  %v142_v46 = vshll.u32 %v141_v45, 23 }
  0xb8   :  { %v143_v47 = vor.u32 4788187, %v142_v46  ;;  %v146_v49 = vcvt.s32.f32 %v139_v37 }
  0xba   :  { %v144_v48 = vand.u32 2147483647, %v143_v47 }
  0xbc   :  { %v147_v50 = vmul.f32 %v146_v49, %v144_v48 }
  0xbe   :  { %v148_v51 = vxor.u32 2147483648, %v147_v50 }
  0xc0   :  { %v149_v52 = vsel %vm28_vm12, %v148_v51, %v147_v50 }
  0xc1   :  { %v152_v54 = vsel %vm27_vm13, %v426_v4, %v149_v52 }
  0xc2   :  { %v154_v55 = vmul.f32 %v152_v54, %v152_v54 }
  0xc4   :  { %v162_v56 = vmul.f32 -0.00019511016, %v154_v55  ;;  %v155_v57 = vmul.f32 -0.001358992, %v154_v55 }
  0xc6   :  { %v163_v59 = vadd.f32 0.008332121, %v162_v56  ;;  %v156_v60 = vadd.f32 0.041655596, %v155_v57 }
  0xc8   :  { %v164_v61 = vmul.f32 %v163_v59, %v154_v55  ;;  %v157_v63 = vmul.f32 %v156_v60, %v154_v55 }
  0xca   :  { %v165_v0 = vadd.f32 -0.16666654, %v164_v61  ;;  %v158_v2 = vadd.f32 -0.4999988, %v157_v63 }
  0xcc   :  { %v166_v6 = vmul.f32 %v165_v0, %v154_v55  ;;  %v159_v7 = vmul.f32 %v158_v2, %v154_v55 }
  0xce   :  { %v167_v8 = vadd.f32 1.0, %v166_v6  ;;  %v160_v9 = vadd.f32 1.0, %v159_v7 }
  0xd0   :  { %v168_v14 = vmul.f32 %v167_v8, %v152_v54  ;;  %v177_v17 = vxor.u32 2147483648, %v160_v9 }
  0xd2   :  { %v174_v18 = vxor.u32 2147483648, %v168_v14  ;;  %v178_v20 = vsel %vm176_vm4, %v177_v17, %v168_v14  ;;  %v332_v22 = vsel %vm330_vm0, %v177_v17, %v168_v14 }
  0xd4   :  { %v175_v19 = vsel %vm173_vm3, %v160_v9, %v174_v18  ;;  %v329_v21 = vsel %vm327_vm15, %v160_v9, %v174_v18 }
  0xd5   :  { %v179_v23 = vsel %vm172_vm2, %v175_v19, %v178_v20  ;;  %v333_v24 = vsel %vm326_vm14, %v329_v21, %v332_v22 }
  0xd6   :  { %v180_v25 = vsel %vm169_vm5, nan, %v179_v23  ;;  %v334_v26 = vsel %vm169_vm5, nan, %v333_v24 }
  0xd7   :  { %v335_v27 = vsel %vm25_vm1, %v180_v25, %v334_v26 }
  0xd8   :  { %337 = vst.msk [vmem:[#allocation2] sm:$0xff] %vm336_vm6, %v335_v27 }
  0xd9   :  { %348 = dma.vmem_to_hbm [thread:$0]  %s344_s1, 128, %s346_s15, [#allocation3]  }
  0xda   :  { %394 = dma.done.wait [#allocation3], 128  }
  0xdb   :  { %395 = vsyncadd [#allocation3], 4294967168 }
  0xdc   :  { %353 = vsyncpa [#allocation3], 1 }

</bundles_post_ra>
